<compile_context>
chip_gen: v5e
topology: v5e:2x2
jax: 0.10.0
libtpu: 0.0.40
codegen_flags: <defaults>
</compile_context>

<pallas_src>
import jax
import jax.numpy as jnp
from jax.experimental import pallas as pl
from jax.experimental.pallas import tpu as pltpu


def _round_up(x, m):
    return (x + m - 1) // m * m


def _pow2_mult128(x):
    """Largest power-of-two multiple of 128 that is <= max(x, 128)."""
    x = max(int(x), 128)
    t = 128
    while t * 2 <= x:
        t *= 2
    return t


def _padded_nodes(n, tile_n, tile_k):
    """Padded node count: a multiple of 128 and of the largest requested tile
    that does not inflate the N^2 adjacency stream by more than ~12.5%/dim."""
    n128 = _round_up(max(int(n), 1), 128)
    pad_to = 128
    for want in (tile_n, tile_k):
        t = _pow2_mult128(want)
        while t > 128 and _round_up(n128, t) > n128 + n128 // 8:
            t //= 2
        pad_to = max(pad_to, t)
    return _round_up(n128, pad_to)


def _pick_tile(total, cap):
    """Largest multiple of 128 that divides `total` (itself a multiple of 128)
    and is <= cap.  128 always qualifies, so this never degenerates to the
    full dimension (which could blow VMEM for an awkward N)."""
    best = 128
    t = 128
    while t <= cap and t <= total:
        if total % t == 0:
            best = t
        t += 128
    return best


def _vmem_cap_bytes():
    """Generation-aware scoped-VMEM cap (physical: 128 MiB v5e/v6e, 64 MiB v7x)."""
    try:
        kind = jax.devices()[0].device_kind.lower()
    except Exception:
        kind = ""
    if "v5" in kind or "v6" in kind:
        return 96 * 1024 * 1024
    return 48 * 1024 * 1024           # conservative for v7x / unknown parts


# ----------------------------------------------------------------------------
# One-time (graph-static / parameter-static) preprocessing.
# ----------------------------------------------------------------------------
def preprocess_graph(adj, *, tile_n=1024, tile_k=2048):
    """adj[u, v] = 1.0 iff edge u -> v.

    Returns:
      at     : [N_pad, N_pad] int8 transposed adjacency, at[v, u] = adj[u, v].
               Holds only 0/1 (the degree term is applied separately), so it
               is exact in the narrowest HBM dtype on every TPU generation;
               the int8 never touches the MXU (upcast to bf16 on the VPU).
      in_deg : [N_pad, 1] f32 incoming-edge count per node.
    """
    n = adj.shape[0]
    n_pad = _padded_nodes(n, tile_n, tile_k)
    at = jnp.zeros((n_pad, n_pad), jnp.int8).at[:n, :n].set(adj.T.astype(jnp.int8))
    in_deg = jnp.zeros((n_pad, 1), jnp.float32).at[:n, 0].set(jnp.sum(adj, axis=0))
    return at, in_deg


def prepare_params(params):
    """Zero-pad weights/biases to lane-dense (multiples of 128) shapes, once."""
    d = params["w_node"].shape[0]
    d_out = params["b_apply"].shape[-1]
    dp = _round_up(d, 128)
    op = _round_up(d_out, 128)
    f32 = jnp.float32
    return dict(
        w_node=jnp.zeros((dp, dp), f32).at[:d, :d].set(params["w_node"]),
        b_node=jnp.zeros((1, dp), f32).at[:, :d].set(params["b_node"]),
        w_apply1=jnp.zeros((dp, op), f32).at[:d, :d_out].set(params["w_apply1"]),
        w_apply2=jnp.zeros((dp, op), f32).at[:d, :d_out].set(params["w_apply2"]),
        b_apply=jnp.zeros((1, op), f32).at[:, :d_out].set(params["b_apply"]),
        in_dims=d,
        out_dims=d_out,
    )


# ----------------------------------------------------------------------------
# Kernels.
# ----------------------------------------------------------------------------
def node_prep_kernel(h_ref, att_ref, deg_ref, wn_ref, bn_ref,
                     hn_ref, ah_ref, dah_ref):
    """apply_nodes + attention scaling + degree term, once per node (hoisted
    out of the O(N^2) message loop)."""
    hn = jnp.dot(h_ref[...], wn_ref[...],
                 preferred_element_type=jnp.float32) + bn_ref[...]
    ah = att_ref[...] * hn
    hn_ref[...] = hn
    ah_ref[...] = ah.astype(jnp.bfloat16)   # streamed bf16 MXU operand
    dah_ref[...] = deg_ref[...] * ah        # destination degree term (f32)


def fact_gcn_kernel(at_ref, ah_ref, hn_ref, dah_ref,
                    w1_ref, w2_ref, ba_ref, out_ref, acc_ref):
    k = pl.program_id(1)

    @pl.when(k == 0)
    def _init():
        acc_ref[...] = jnp.zeros_like(acc_ref)

    # Message + sum over incoming edges on the native bf16 MXU path:
    #   acc[v] += sum_u AT[v, u] * ah[u]     (AT is 0/1 int8, VPU-upcast)
    acc_ref[...] += jnp.dot(at_ref[...].astype(jnp.bfloat16), ah_ref[...],
                            preferred_element_type=jnp.float32)

    @pl.when(k == pl.num_programs(1) - 1)
    def _finalize():
        h_sum = acc_ref[...] + dah_ref[...]          # + in_deg * ah (dst term)
        # relu(apply_fc(cat([hn, h_sum], dim=1))) as a split matmul.
        pre = (jnp.dot(hn_ref[...], w1_ref[...], preferred_element_type=jnp.float32)
               + jnp.dot(h_sum, w2_ref[...], preferred_element_type=jnp.float32)
               + ba_ref[...])
        out_ref[...] = jnp.maximum(pre, 0.0)


# ----------------------------------------------------------------------------
# Wrapper.
# ----------------------------------------------------------------------------
def fact_gcn_layer(h, att, at, in_deg, params, *, tile_n=1024, tile_k=2048):
    """h: [N, D] f32, att: [N, 1] f32, (at, in_deg): preprocess_graph output,
    params: prepare_params output."""
    n, d = h.shape
    n_pad = at.shape[0]
    dp = params["w_node"].shape[0]
    op = params["b_apply"].shape[-1]
    d_out = params["out_dims"]

    tn = _pick_tile(n_pad, tile_n)    # output-row tile      ("parallel")
    tk = _pick_tile(n_pad, tile_k)    # contraction-axis tile ("arbitrary")

    # Per-call padding of the dynamic node data only (graph/params padded once).
    h_p = jnp.zeros((n_pad, dp), jnp.float32).at[:n, :d].set(h)
    att_p = jnp.zeros((n_pad, 1), jnp.float32).at[:n, :].set(att)

    # --- prep pass: hn = node_fc(h); ah = att*hn (bf16); dah = in_deg*ah -----
    hn, ah, dah = pl.pallas_call(
        node_prep_kernel,
        out_shape=(jax.ShapeDtypeStruct((n_pad, dp), jnp.float32),
                   jax.ShapeDtypeStruct((n_pad, dp), jnp.bfloat16),
                   jax.ShapeDtypeStruct((n_pad, dp), jnp.float32)),
        grid_spec=pltpu.PrefetchScalarGridSpec(
            num_scalar_prefetch=0,
            grid=(n_pad // tn,),
            in_specs=[
                pl.BlockSpec((tn, dp), lambda i: (i, 0)),   # h
                pl.BlockSpec((tn, 1), lambda i: (i, 0)),    # att
                pl.BlockSpec((tn, 1), lambda i: (i, 0)),    # in_deg
                pl.BlockSpec((dp, dp), lambda i: (0, 0)),   # W_node
                pl.BlockSpec((1, dp), lambda i: (0, 0)),    # b_node
            ],
            out_specs=[
                pl.BlockSpec((tn, dp), lambda i: (i, 0)),   # hn   (f32)
                pl.BlockSpec((tn, dp), lambda i: (i, 0)),   # ah   (bf16)
                pl.BlockSpec((tn, dp), lambda i: (i, 0)),   # dah  (f32)
            ],
        ),
        compiler_params=pltpu.CompilerParams(
            dimension_semantics=("parallel",)),
    )(h_p, att_p, in_deg, params["w_node"], params["b_node"])

    # --- main pass: h_sum = AT@ah + dah; out = relu(hn@W1 + h_sum@W2 + b) ----
    vmem_est = (2 * (tn * tk * 1            # int8 adjacency tile
                     + tk * dp * 2          # bf16 ah k-tile
                     + 2 * tn * dp * 4      # f32 hn / dah i-tiles
                     + tn * op * 4)         # f32 out tile
                + (2 * dp * op + op) * 4    # resident apply weights / bias
                + tn * dp * 4)              # f32 accumulator
    vmem_limit = int(min(max(2 * vmem_est, 32 * 1024 * 1024), _vmem_cap_bytes()))

    grid = (n_pad // tn, n_pad // tk)
    out_p = pl.pallas_call(
        fact_gcn_kernel,
        out_shape=jax.ShapeDtypeStruct((n_pad, op), jnp.float32),
        grid_spec=pltpu.PrefetchScalarGridSpec(
            num_scalar_prefetch=0,
            grid=grid,
            in_specs=[
                # NOTE(v7x): pipeline_mode=pl.Buffered(3) here can hide
                # DMA-issue latency at 3.2 TB/s if 2-deep exposes it.
                pl.BlockSpec((tn, tk), lambda i, k: (i, k)),   # AT tile (int8)
                pl.BlockSpec((tk, dp), lambda i, k: (k, 0)),   # ah k-tile (bf16)
                pl.BlockSpec((tn, dp), lambda i, k: (i, 0)),   # hn i-tile (f32)
                pl.BlockSpec((tn, dp), lambda i, k: (i, 0)),   # dah i-tile (f32)
                pl.BlockSpec((dp, op), lambda i, k: (0, 0)),   # W_apply (hn part)
                pl.BlockSpec((dp, op), lambda i, k: (0, 0)),   # W_apply (h_sum part)
                pl.BlockSpec((1, op), lambda i, k: (0, 0)),    # b_apply
            ],
            out_specs=pl.BlockSpec((tn, op), lambda i, k: (i, 0)),
            scratch_shapes=[pltpu.VMEM((tn, dp), jnp.float32)],
        ),
        compiler_params=pltpu.CompilerParams(
            dimension_semantics=("parallel", "arbitrary"),
            vmem_limit_bytes=vmem_limit,
        ),
    )(at, ah, hn, dah,
      params["w_apply1"], params["w_apply2"], params["b_apply"])

    return out_p[:n, :d_out]


if __name__ == "__main__":
    key = jax.random.PRNGKey(0)
    n, in_dims, out_dims = 16, 32, 32
    ks = jax.random.split(key, 5)

    # Graph node data: h [N, D], att [N, 1]; dense adjacency [N, N].
    h = jax.random.normal(ks[0], (n, in_dims), jnp.float32)
    att = jax.random.uniform(ks[1], (n, 1), jnp.float32)
    adj = (jax.random.uniform(ks[2], (n, n)) < 0.3).astype(jnp.float32)
    adj = adj * (1.0 - jnp.eye(n, dtype=jnp.float32))  # no self loops

    # Deterministic parameter init (PyTorch nn.Linear default: U(-1/sqrt(fan_in), ...)).
    def linear_init(k, fan_in, fan_out):
        kw, kb = jax.random.split(k)
        bound = 1.0 / (fan_in ** 0.5)
        w = jax.random.uniform(kw, (fan_in, fan_out), jnp.float32, -bound, bound)  # = W.T
        b = jax.random.uniform(kb, (1, fan_out), jnp.float32, -bound, bound)
        return w, b

    w_node, b_node = linear_init(ks[3], in_dims, in_dims)           # node_fc
    w_apply, b_apply = linear_init(ks[4], 2 * in_dims, out_dims)    # apply_fc
    raw_params = dict(
        w_node=w_node, b_node=b_node,
        w_apply1=w_apply[:in_dims],   # rows multiplying hn
        w_apply2=w_apply[in_dims:],   # rows multiplying h_sum
        b_apply=b_apply,
    )

    # One-time graph / parameter preprocessing (static across forward calls).
    at, in_deg = preprocess_graph(adj)
    params = prepare_params(raw_params)

    out = jax.block_until_ready(fact_gcn_layer(h, att, at, in_deg, params))

    # Pure-f32 reference (forward-pass semantics).
    hn_r = h @ w_node + b_node
    ah_r = att * hn_r
    h_sum_r = adj.T @ ah_r + jnp.sum(adj, axis=0, keepdims=True).T * ah_r
    ref = jnp.maximum(jnp.concatenate([hn_r, h_sum_r], axis=1) @ w_apply + b_apply, 0.0)

    # bf16-aware reference (the kernel streams ah in bf16 for the message matmul).
    ah_b = ah_r.astype(jnp.bfloat16).astype(jnp.float32)
    h_sum_b = adj.T @ ah_b + jnp.sum(adj, axis=0, keepdims=True).T * ah_r
    ref_b = jnp.maximum(jnp.concatenate([hn_r, h_sum_b], axis=1) @ w_apply + b_apply, 0.0)

    assert out.shape == (n, out_dims)
    assert jnp.allclose(out, ref_b, atol=2e-2, rtol=2e-2)
    assert jnp.allclose(out, ref, atol=5e-2, rtol=5e-2)

    print("KERNEL_OK")
</pallas_src>

<mosaic_0001>
module attributes {stable_mosaic.version = 11 : i64} {
  func.func @node_prep_kernel(%arg0: i32, %arg1: memref<128x128xf32, #tpu.memory_space<vmem>>, %arg2: memref<128x1xf32, #tpu.memory_space<vmem>>, %arg3: memref<128x1xf32, #tpu.memory_space<vmem>>, %arg4: memref<128x128xf32, #tpu.memory_space<vmem>>, %arg5: memref<1x128xf32, #tpu.memory_space<vmem>>, %arg6: memref<128x128xf32, #tpu.memory_space<vmem>>, %arg7: memref<128x128xbf16, #tpu.memory_space<vmem>>, %arg8: memref<128x128xf32, #tpu.memory_space<vmem>>) attributes {dimension_semantics = [#tpu.dimension_semantics<parallel>], iteration_bounds = array<i64: 1>, scalar_prefetch = 0 : i64, scratch_operands = 0 : i64, tpu.core_type = #tpu.core_type<tc>, window_params = [{transform_indices = @transform_0, window_bounds = array<i64: 128, 128>}, {transform_indices = @transform_1, window_bounds = array<i64: 128, 1>}, {transform_indices = @transform_2, window_bounds = array<i64: 128, 1>}, {pipeline_mode = #tpu.pipeline_mode<synchronous>, transform_indices = @transform_3, window_bounds = array<i64: 128, 128>}, {pipeline_mode = #tpu.pipeline_mode<synchronous>, transform_indices = @transform_4, window_bounds = array<i64: 1, 128>}, {transform_indices = @transform_5, window_bounds = array<i64: 128, 128>}, {transform_indices = @transform_6, window_bounds = array<i64: 128, 128>}, {transform_indices = @transform_7, window_bounds = array<i64: 128, 128>}]} {
    %c0 = arith.constant 0 : index
    %c0_0 = arith.constant 0 : index
    %0 = vector.load %arg1[%c0, %c0_0] : memref<128x128xf32, #tpu.memory_space<vmem>>, vector<128x128xf32>
    %c0_1 = arith.constant 0 : index
    %c0_2 = arith.constant 0 : index
    %1 = vector.load %arg4[%c0_1, %c0_2] : memref<128x128xf32, #tpu.memory_space<vmem>>, vector<128x128xf32>
    %cst = arith.constant dense<0.000000e+00> : vector<128x128xf32>
    %2 = tpu.matmul %0, %1, %cst {dimension_numbers = #tpu.dot_dimension_numbers<[1], [0], [0], [1], [0, 0, 1, 1], [], []>} : vector<128x128xf32>, vector<128x128xf32>, vector<128x128xf32> -> vector<128x128xf32>
    %c0_3 = arith.constant 0 : index
    %c0_4 = arith.constant 0 : index
    %3 = vector.load %arg5[%c0_3, %c0_4] : memref<1x128xf32, #tpu.memory_space<vmem>>, vector<1x128xf32>
    %4 = vector.broadcast %3 : vector<1x128xf32> to vector<128x128xf32>
    %5 = arith.addf %2, %4 : vector<128x128xf32>
    %c0_5 = arith.constant 0 : index
    %c0_6 = arith.constant 0 : index
    %6 = vector.load %arg2[%c0_5, %c0_6] : memref<128x1xf32, #tpu.memory_space<vmem>>, vector<128x1xf32>
    %7 = vector.broadcast %6 : vector<128x1xf32> to vector<128x128xf32>
    %8 = arith.mulf %7, %5 : vector<128x128xf32>
    %c0_7 = arith.constant 0 : index
    %c0_8 = arith.constant 0 : index
    %9 = vector.load %arg6[%c0_7, %c0_8] : memref<128x128xf32, #tpu.memory_space<vmem>>, vector<128x128xf32>
    tpu.vector_store %arg6[%c0_7, %c0_8], %5 {strides = array<i32>} : memref<128x128xf32, #tpu.memory_space<vmem>>, vector<128x128xf32>,
    %10 = arith.truncf %8 : vector<128x128xf32> to vector<128x128xbf16>
    %c0_9 = arith.constant 0 : index
    %c0_10 = arith.constant 0 : index
    %11 = vector.load %arg7[%c0_9, %c0_10] : memref<128x128xbf16, #tpu.memory_space<vmem>>, vector<128x128xbf16>
    tpu.vector_store %arg7[%c0_9, %c0_10], %10 {strides = array<i32>} : memref<128x128xbf16, #tpu.memory_space<vmem>>, vector<128x128xbf16>,
    %c0_11 = arith.constant 0 : index
    %c0_12 = arith.constant 0 : index
    %12 = vector.load %arg3[%c0_11, %c0_12] : memref<128x1xf32, #tpu.memory_space<vmem>>, vector<128x1xf32>
    %13 = vector.broadcast %12 : vector<128x1xf32> to vector<128x128xf32>
    %14 = arith.mulf %13, %8 : vector<128x128xf32>
    %c0_13 = arith.constant 0 : index
    %c0_14 = arith.constant 0 : index
    %15 = vector.load %arg8[%c0_13, %c0_14] : memref<128x128xf32, #tpu.memory_space<vmem>>, vector<128x128xf32>
    tpu.vector_store %arg8[%c0_13, %c0_14], %14 {strides = array<i32>} : memref<128x128xf32, #tpu.memory_space<vmem>>, vector<128x128xf32>,
    return
  }
  func.func @transform_0(%arg0: i32) -> (i32, i32) {
    %c0_i32 = arith.constant 0 : i32
    %c0_i32_0 = arith.constant 0 : i32
    return %arg0, %c0_i32 : i32, i32
  }
  func.func @transform_1(%arg0: i32) -> (i32, i32) {
    %c0_i32 = arith.constant 0 : i32
    %c0_i32_0 = arith.constant 0 : i32
    return %arg0, %c0_i32 : i32, i32
  }
  func.func @transform_2(%arg0: i32) -> (i32, i32) {
    %c0_i32 = arith.constant 0 : i32
    %c0_i32_0 = arith.constant 0 : i32
    return %arg0, %c0_i32 : i32, i32
  }
  func.func @transform_3(%arg0: i32) -> (i32, i32) {
    %c0_i32 = arith.constant 0 : i32
    %c0_i32_0 = arith.constant 0 : i32
    %c0_i32_1 = arith.constant 0 : i32
    return %c0_i32, %c0_i32_0 : i32, i32
  }
  func.func @transform_4(%arg0: i32) -> (i32, i32) {
    %c0_i32 = arith.constant 0 : i32
    %c0_i32_0 = arith.constant 0 : i32
    %c0_i32_1 = arith.constant 0 : i32
    return %c0_i32, %c0_i32_0 : i32, i32
  }
  func.func @transform_5(%arg0: i32) -> (i32, i32) {
    %c0_i32 = arith.constant 0 : i32
    %c0_i32_0 = arith.constant 0 : i32
    return %arg0, %c0_i32 : i32, i32
  }
  func.func @transform_6(%arg0: i32) -> (i32, i32) {
    %c0_i32 = arith.constant 0 : i32
    %c0_i32_0 = arith.constant 0 : i32
    return %arg0, %c0_i32 : i32, i32
  }
  func.func @transform_7(%arg0: i32) -> (i32, i32) {
    %c0_i32 = arith.constant 0 : i32
    %c0_i32_0 = arith.constant 0 : i32
    return %arg0, %c0_i32 : i32, i32
  }
}

</mosaic_0001>

<bundles_post_ra>
// kernel: tpu_custom_call.1
= control target key start
LH: loop header
LB: loop body
LE: loop exit
PB: predicated region body
PF: predicated region fallthrough
CT: control target
= control target key end

     0   :  { %13 = vsyncpa [#allocation3], 0  ;;  %v650_v1 = vmov 0   ;;  %s973_s0 = inlined_call_operand.vmem [shape: f32[128,128], index: 0, kind: input, shape index: {}]   ;;  %s974_s1 = inlined_call_operand.vmem [shape: f32[128,1], index: 1, kind: input, shape index: {}]   ;;  %s975_s2 = inlined_call_operand.vmem [shape: f32[128,1], index: 2, kind: input, shape index: {}]   ;;  %s976_s3 = inlined_call_operand.vmem [shape: f32[128,128], index: 3, kind: input, shape index: {}]   ;;  %s977_s4 = inlined_call_operand.vmem [shape: f32[1,128], index: 4, kind: input, shape index: {}]   ;;  %s978_s5 = inlined_call_operand.hbm [shape: f32[128,128], index: 5, kind: output, shape index: {0}]   ;;  %s979_s6 = inlined_call_operand.hbm [shape: bf16[128,128], index: 6, kind: output, shape index: {1}]   ;;  %s980_s7 = inlined_call_operand.hbm [shape: f32[128,128], index: 7, kind: output, shape index: {2}]  }
   0x1   :  { %v56_v0 = vld [vmem:[%s976_s3 + $0x78] sm:$0xff]  ;;  %572 = vset.pattern.permute.xlu2 %v650_v1  ;;  %571 = vset.pattern.permute.xlu1 %v650_v1  ;;  %v130_v2 = vld [vmem:[%s974_s1 + $0x20] sm:$0xff]  ;;  %v128_v3 = vld [vmem:[%s974_s1 + $0x10] sm:$0xff] }
   0x2   :  { %570 = vset.pattern.permute.xlu0 %v650_v1  ;;  %61 = vmatpush.msra.mxu0 %v56_v0  ;;  %v126_v4 = vld [vmem:[%s974_s1] sm:$0xff]  ;;  %v55_v5 = vld [vmem:[%s976_s3 + $0x70] sm:$0xff]  ;;  %v54_v6 = vld [vmem:[%s976_s3 + $0x68] sm:$0xff] }
   0x3   :  { %514 = vmatpush.msra.mxu1 %v56_v0  ;;  %515 = vmatpush.msra.mxu2 %v56_v0  ;;  %v53_v7 = vld [vmem:[%s976_s3 + $0x60] sm:$0xff]  ;;  %v52_v8 = vld [vmem:[%s976_s3 + $0x58] sm:$0xff]  ;;  %v131_v9 = vld [vmem:[%s974_s1 + $0x28] sm:$0xff] }
   0x4   :  { %516 = vmatpush.msra.mxu3 %v56_v0  ;;  %164 = vperm.xlu2 %572, %v130_v2   ;;  %v129_v10 = vld [vmem:[%s974_s1 + $0x18] sm:$0xff]  ;;  %v127_v11 = vld [vmem:[%s974_s1 + $0x8] sm:$0xff]  ;;  %v51_v12 = vld [vmem:[%s976_s3 + $0x50] sm:$0xff] }
   0x5   :  { %154 = vperm.xlu1 %571, %v128_v3   ;;  %144 = vperm.xlu0 %570, %v126_v4  }
   0x6   :  { %62 = vmatpush.msra.mxu0 %v55_v5  ;;  %517 = vmatpush.msra.mxu1 %v55_v5 }
   0x7   :  { %518 = vmatpush.msra.mxu2 %v55_v5  ;;  %519 = vmatpush.msra.mxu3 %v55_v5 }
   0x8   :  { %63 = vmatpush.msra.mxu0 %v54_v6  ;;  %520 = vmatpush.msra.mxu1 %v54_v6 }
   0x9   :  { %521 = vmatpush.msra.mxu2 %v54_v6  ;;  %522 = vmatpush.msra.mxu3 %v54_v6 }
   0xa   :  { %64 = vmatpush.msra.mxu0 %v53_v7  ;;  %523 = vmatpush.msra.mxu1 %v53_v7 }
   0xb   :  { %524 = vmatpush.msra.mxu2 %v53_v7  ;;  %525 = vmatpush.msra.mxu3 %v53_v7 }
   0xc   :  { %65 = vmatpush.msra.mxu0 %v52_v8  ;;  %526 = vmatpush.msra.mxu1 %v52_v8 }
   0xd   :  { %14 = vsyncpa [#allocation5], 0  ;;  %527 = vmatpush.msra.mxu2 %v52_v8  ;;  %528 = vmatpush.msra.mxu3 %v52_v8  ;;  %v50_v13 = vld [vmem:[%s976_s3 + $0x48] sm:$0xff]  ;;  %v49_v14 = vld [vmem:[%s976_s3 + $0x40] sm:$0xff]  ;;  %s420_s12 = sshll.u32 %s978_s5, 4  ;;  %s652_s5 = smov [#allocation4]   ;;  %s421_s12 = int_to_ptr.hbm [resolvable:$true] %s420_s12 }
   0xe   :  { %169 = vperm.xlu2 %572, %v131_v9   ;;  %159 = vperm.xlu1 %571, %v129_v10   ;;  %v48_v15 = vld [vmem:[%s976_s3 + $0x38] sm:$0xff]  ;;  %v134_v16 = vld [vmem:[%s974_s1 + $0x40] sm:$0xff]  ;;  %v132_v18 = vld [vmem:[%s974_s1 + $0x30] sm:$0xff]  ;;  %s964_s13 = sshll.u32 %s652_s5, 4  ;;  %s433_s16 = sshll.u32 %s979_s6, 4  ;;  %s432_s13 = int_to_ptr.vmem [resolvable:$true] %s964_s13  ;;  %s434_s16 = int_to_ptr.hbm [resolvable:$true] %s433_s16 }
   0xf   :  { %149 = vperm.xlu0 %570, %v127_v11   ;;  %66 = vmatpush.msra.mxu0 %v51_v12  ;;  %v133_v17 = vld [vmem:[%s974_s1 + $0x38] sm:$0xff]  ;;  %v47_v19 = vld [vmem:[%s976_s3 + $0x30] sm:$0xff]  ;;  %v46_v20 = vld [vmem:[%s976_s3 + $0x28] sm:$0xff]  ;;  %s655_s17 = smov [#allocation6]   ;;  %s656_s6 = smov 64  }
  0x10   :  { %529 = vmatpush.msra.mxu1 %v51_v12  ;;  %530 = vmatpush.msra.mxu2 %v51_v12  ;;  %v45_v21 = vld [vmem:[%s976_s3 + $0x20] sm:$0xff]  ;;  %v44_v22 = vld [vmem:[%s976_s3 + $0x18] sm:$0xff]  ;;  %v136_v24 = vld [vmem:[%s974_s1 + $0x50] sm:$0xff]  ;;  %s444_s18 = sshll.u32 %s655_s17, 4  ;;  %s657_s21 = smov 4   ;;  %s445_s18 = int_to_ptr.vmem [resolvable:$true] %s444_s18 }
  0x11   :  { %531 = vmatpush.msra.mxu3 %v51_v12  ;;  %67 = vmatpush.msra.mxu0 %v50_v13  ;;  %v137_v23 = vld [vmem:[%s974_s1 + $0x58] sm:$0xff]  ;;  %v135_v25 = vld [vmem:[%s974_s1 + $0x48] sm:$0xff]  ;;  %v43_v26 = vld [vmem:[%s976_s3 + $0x10] sm:$0xff] }
  0x12   :  { %532 = vmatpush.msra.mxu1 %v50_v13  ;;  %533 = vmatpush.msra.mxu2 %v50_v13  ;;  %v42_v27 = vld [vmem:[%s976_s3 + $0x8] sm:$0xff]  ;;  %v41_v28 = vld [vmem:[%s976_s3] sm:$0xff]  ;;  %v140_v33 = vld [vmem:[%s974_s1 + $0x70] sm:$0xff]  ;;  %s653_s3 = smov 128  }
  0x13   :  { %534 = vmatpush.msra.mxu3 %v50_v13  ;;  %68 = vmatpush.msra.mxu0 %v49_v14  ;;  %v25_v29 = vld [vmem:[%s973_s0] sm:$0xff]  ;;  %v139_v34 = vld [vmem:[%s974_s1 + $0x68] sm:$0xff]  ;;  %v141_v42 = vld [vmem:[%s974_s1 + $0x78] sm:$0xff] }
  0x14   :  { %535 = vmatpush.msra.mxu1 %v49_v14  ;;  %536 = vmatpush.msra.mxu2 %v49_v14  ;;  %v29_v30 = vld [vmem:[%s973_s0 + $0x20] sm:$0xff]  ;;  %v26_v36 = vld [vmem:[%s973_s0 + $0x8] sm:$0xff]  ;;  %v27_v43 = vld [vmem:[%s973_s0 + $0x10] sm:$0xff] }
  0x15   :  { %537 = vmatpush.msra.mxu3 %v49_v14  ;;  %69 = vmatpush.msra.mxu0 %v48_v15  ;;  %v33_v31 = vld [vmem:[%s973_s0 + $0x40] sm:$0xff]  ;;  %v30_v37 = vld [vmem:[%s973_s0 + $0x28] sm:$0xff]  ;;  %v31_v44 = vld [vmem:[%s973_s0 + $0x30] sm:$0xff] }
  0x16   :  { %538 = vmatpush.msra.mxu1 %v48_v15  ;;  %539 = vmatpush.msra.mxu2 %v48_v15  ;;  %v37_v32 = vld [vmem:[%s973_s0 + $0x60] sm:$0xff]  ;;  %v34_v38 = vld [vmem:[%s973_s0 + $0x48] sm:$0xff]  ;;  %v35_v45 = vld [vmem:[%s973_s0 + $0x50] sm:$0xff] }
  0x17   :  { %540 = vmatpush.msra.mxu3 %v48_v15  ;;  %184 = vperm.xlu2 %572, %v134_v16   ;;  %v138_v35 = vld [vmem:[%s974_s1 + $0x60] sm:$0xff]  ;;  %v38_v39 = vld [vmem:[%s973_s0 + $0x68] sm:$0xff]  ;;  %v39_v46 = vld [vmem:[%s973_s0 + $0x70] sm:$0xff]  ;;  %s446_s1 = sshll.u32 %s980_s7, 4  ;;  %s447_s1 = int_to_ptr.hbm [resolvable:$true] %s446_s1 }
  0x18   :  { %179 = vperm.xlu1 %571, %v133_v17   ;;  %174 = vperm.xlu0 %570, %v132_v18   ;;  %v287_v40 = vld [vmem:[%s975_s2 + $0x8] sm:$0xff]  ;;  %v286_v41 = vld [vmem:[%s975_s2] sm:$0xff]  ;;  %v289_v48 = vld [vmem:[%s975_s2 + $0x18] sm:$0xff] }
  0x19   :  { %70 = vmatpush.msra.mxu0 %v47_v19  ;;  %541 = vmatpush.msra.mxu1 %v47_v19  ;;  %v290_v47 = vld [vmem:[%s975_s2 + $0x20] sm:$0xff]  ;;  %v288_v49 = vld [vmem:[%s975_s2 + $0x10] sm:$0xff]  ;;  %v28_v50 = vld [vmem:[%s973_s0 + $0x18] sm:$0xff] }
  0x1a   :  { %542 = vmatpush.msra.mxu2 %v47_v19  ;;  %543 = vmatpush.msra.mxu3 %v47_v19  ;;  %v32_v51 = vld [vmem:[%s973_s0 + $0x38] sm:$0xff]  ;;  %v292_v55 = vld [vmem:[%s975_s2 + $0x30] sm:$0xff]  ;;  %v291_v56 = vld [vmem:[%s975_s2 + $0x28] sm:$0xff] }
  0x1b   :  { %71 = vmatpush.msra.mxu0 %v46_v20  ;;  %544 = vmatpush.msra.mxu1 %v46_v20  ;;  %v36_v52 = vld [vmem:[%s973_s0 + $0x58] sm:$0xff]  ;;  %v296_v57 = vld [vmem:[%s975_s2 + $0x50] sm:$0xff]  ;;  %v295_v58 = vld [vmem:[%s975_s2 + $0x48] sm:$0xff] }
  0x1c   :  { %545 = vmatpush.msra.mxu2 %v46_v20  ;;  %546 = vmatpush.msra.mxu3 %v46_v20  ;;  %v40_v53 = vld [vmem:[%s973_s0 + $0x78] sm:$0xff]  ;;  %v294_v59 = vld [vmem:[%s975_s2 + $0x40] sm:$0xff]  ;;  %v299_v60 = vld [vmem:[%s975_s2 + $0x68] sm:$0xff]  ;;  %s654_s0 = smov 8  }
  0x1d   :  { %72 = vmatpush.msra.mxu0 %v45_v21  ;;  %547 = vmatpush.msra.mxu1 %v45_v21  ;;  %v293_v54 = vld [vmem:[%s975_s2 + $0x38] sm:$0xff]  ;;  %v298_v61 = vld [vmem:[%s975_s2 + $0x60] sm:$0xff]  ;;  %v300_v0 = vld [vmem:[%s975_s2 + $0x70] sm:$0xff] }
  0x1e   :  { %548 = vmatpush.msra.mxu2 %v45_v21  ;;  %549 = vmatpush.msra.mxu3 %v45_v21  ;;  %v297_v62 = vld [vmem:[%s975_s2 + $0x58] sm:$0xff]  ;;  %v913_v18 = vld [vmem:[%s977_s4] ss:$0 sm:$0xff]  ;;  %s651_s4 = smov [#allocation2]  }
  0x1f   :  { %73 = vmatpush.msra.mxu0 %v44_v22  ;;  %550 = vmatpush.msra.mxu1 %v44_v22  ;;  %v301_v63 = vld [vmem:[%s975_s2 + $0x78] sm:$0xff]  ;;  %s952_s9 = sshll.u32 %s651_s4, 4  ;;  %s419_s9 = int_to_ptr.vmem [resolvable:$true] %s952_s9 }
  0x20   :  { %551 = vmatpush.msra.mxu2 %v44_v22  ;;  %552 = vmatpush.msra.mxu3 %v44_v22 }
  0x21   :  { %199 = vperm.xlu2 %572, %v137_v23   ;;  %194 = vperm.xlu1 %571, %v136_v24  }
  0x22   :  { %189 = vperm.xlu0 %570, %v135_v25   ;;  %74 = vmatpush.msra.mxu0 %v43_v26 }
  0x23   :  { %553 = vmatpush.msra.mxu1 %v43_v26  ;;  %554 = vmatpush.msra.mxu2 %v43_v26 }
  0x24   :  { %555 = vmatpush.msra.mxu3 %v43_v26  ;;  %75 = vmatpush.msra.mxu0 %v42_v27 }
  0x25   :  { %556 = vmatpush.msra.mxu1 %v42_v27  ;;  %557 = vmatpush.msra.mxu2 %v42_v27 }
  0x26   :  { %558 = vmatpush.msra.mxu3 %v42_v27  ;;  %76 = vmatpush.msra.mxu0 %v41_v28 }
  0x27   :  { %559 = vmatpush.msra.mxu1 %v41_v28  ;;  %560 = vmatpush.msra.mxu2 %v41_v28 }
  0x28   :  { %561 = vmatpush.msra.mxu3 %v41_v28  ;;  %77 = vmatmul.f32.vlgmr.msra.gmra.mxu0 %v25_v29 }
  0x29   :  { %89 = vmatmul.f32.vlgmr.msra.gmra.mxu1 %v29_v30  ;;  %101 = vmatmul.f32.vlgmr.msra.gmra.mxu2 %v33_v31 }
  0x2a   :  { %113 = vmatmul.f32.vlgmr.msra.gmra.mxu3 %v37_v32  ;;  %214 = vperm.xlu2 %572, %v140_v33  }
  0x2b   :  { %209 = vperm.xlu1 %571, %v139_v34   ;;  %204 = vperm.xlu0 %570, %v138_v35  }
  0x30   :  { %80 = vmatmul.f32.gmra.mxu0 %v26_v36 }
  0x31   :  { %92 = vmatmul.f32.gmra.mxu1 %v30_v37  ;;  %104 = vmatmul.f32.gmra.mxu2 %v34_v38 }
  0x32   :  { %116 = vmatmul.f32.gmra.mxu3 %v38_v39  ;;  %309 = vperm.xlu2 %572, %v287_v40  }
  0x33   :  { %304 = vperm.xlu1 %571, %v286_v41   ;;  %219 = vperm.xlu0 %570, %v141_v42  }
  0x38   :  { %83 = vmatmul.f32.gmra.mxu0 %v27_v43 }
  0x39   :  { %95 = vmatmul.f32.gmra.mxu1 %v31_v44  ;;  %107 = vmatmul.f32.gmra.mxu2 %v35_v45 }
  0x3a   :  { %119 = vmatmul.f32.gmra.mxu3 %v39_v46  ;;  %324 = vperm.xlu2 %572, %v290_v47  }
  0x3b   :  { %319 = vperm.xlu1 %571, %v289_v48   ;;  %314 = vperm.xlu0 %570, %v288_v49  }
  0x40   :  { %86 = vmatmul.f32.gmra.mxu0 %v28_v50 }
  0x41   :  { %98 = vmatmul.f32.gmra.mxu1 %v32_v51  ;;  %110 = vmatmul.f32.gmra.mxu2 %v36_v52 }
  0x42   :  { %122 = vmatmul.f32.gmra.mxu3 %v40_v53  ;;  %339 = vperm.xlu2 %572, %v293_v54  }
  0x43   :  { %334 = vperm.xlu1 %571, %v292_v55   ;;  %329 = vperm.xlu0 %570, %v291_v56  }
  0x4a   :  { %354 = vperm.xlu2 %572, %v296_v57  }
  0x4b   :  { %349 = vperm.xlu1 %571, %v295_v58   ;;  %344 = vperm.xlu0 %570, %v294_v59  }
  0x52   :  { %369 = vperm.xlu2 %572, %v299_v60  }
  0x53   :  { %364 = vperm.xlu1 %571, %v298_v61   ;;  %359 = vperm.xlu0 %570, %v297_v62  }
  0x5b   :  { %379 = vperm.xlu1 %571, %v301_v63   ;;  %374 = vperm.xlu0 %570, %v300_v0  }
  0x5e   :  { %v165_v1 = vpop.permute.xlu2 %164 }
  0x68   :  { %v170_v2 = vpop.permute.xlu2 %169 }
  0x71   :  { %v890_v3 = vpop.permute.xlu2 %184 }
  0x77   :  { %v892_v4 = vpop.permute.xlu1 %154  ;;  %v145_v5 = vpop.permute.xlu0 %144 }
  0x7b   :  { %v894_v6 = vpop.permute.xlu2 %199 }
  0x80   :  { %v896_v7 = vpop.permute.xlu1 %159 }
  0x81   :  { %v150_v8 = vpop.permute.xlu0 %149 }
  0x84   :  { %v898_v9 = vpop.permute.xlu2 %214 }
  0x8a   :  { %v900_v10 = vpop.permute.xlu1 %179  ;;  %v902_v11 = vpop.permute.xlu0 %174 }
  0x8c   :  { %v310_v12 = vpop.permute.xlu2 %309 }
  0x93   :  { %v904_v13 = vpop.permute.xlu1 %194 }
  0x94   :  { %v906_v14 = vpop.permute.xlu0 %189  ;;  %v325_v15 = vpop.permute.xlu2 %324 }
  0x9c   :  { %v915_v19 = vpop.permute.xlu2 %339 }
  0x9d   :  { %v210_v16 = vpop.permute.xlu1 %209  ;;  %v908_v17 = vpop.permute.xlu0 %204 }
  0xa4   :  { %v355_v37 = vpop.permute.xlu2 %354 }
  0xa5   :  { %v305_v20 = vpop.permute.xlu1 %304  ;;  %v917_v21 = vpop.permute.xlu0 %219 }
  0xa6   :  { %v78_v22 = vpop.f32.mrf.mxu0  ;;  %v90_v23 = vpop.f32.mrf.mxu1 }
  0xa7   :  { %v79_v24 = vadd.f32 %v913_v18, %v78_v22  ;;  %v91_v25 = vadd.f32 %v913_v18, %v90_v23 }
  0xa9   :  { %v222_v26 = vmul.f32 %v145_v5, %v79_v24  ;;  %238 = vst [vmem:[#allocation2] sm:$0xff] %v79_v24  ;;  %v226_v27 = vmul.f32 %v165_v1, %v91_v25 }
  0xaa   :  { %242 = vst [vmem:[#allocation2 + $0x20] sm:$0xff] %v91_v25 }
  0xab   :  { %v382_v28 = vmul.f32 %v305_v20, %v222_v26  ;;  %v386_v29 = vmul.f32 %v325_v15, %v226_v27 }
  0xac   :  { %v102_v30 = vpop.f32.mrf.mxu2  ;;  %v370_v58 = vpop.permute.xlu2 %369 }
  0xad   :  { %398 = vst [vmem:[#allocation6] sm:$0xff] %v382_v28  ;;  %v103_v31 = vadd.f32 %v913_v18, %v102_v30  ;;  %v114_v32 = vpop.f32.mrf.mxu3  ;;  %v922_v33 = vpop.permute.xlu1 %319 }
  0xae   :  { %402 = vst [vmem:[#allocation6 + $0x20] sm:$0xff] %v386_v29  ;;  %v925_v34 = vadd.f32 %v913_v18, %v114_v32  ;;  %v315_v35 = vpop.permute.xlu0 %314  ;;  %v81_v36 = vpop.f32.mrf.mxu0 }
  0xaf   :  { %246 = vst [vmem:[#allocation2 + $0x40] sm:$0xff] %v103_v31  ;;  %v82_v38 = vadd.f32 %v913_v18, %v81_v36  ;;  %v93_v39 = vpop.f32.mrf.mxu1  ;;  %v230_v15 = vmul.f32 %v890_v3, %v103_v31 }
  0xb0   :  { %250 = vst [vmem:[#allocation2 + $0x60] sm:$0xff] %v925_v34  ;;  %v94_v40 = vadd.f32 %v913_v18, %v93_v39 }
  0xb1   :  { %v223_v41 = vmul.f32 %v150_v8, %v82_v38  ;;  %239 = vst [vmem:[#allocation2 + $0x8] sm:$0xff] %v82_v38 }
  0xb2   :  { %243 = vst [vmem:[#allocation2 + $0x28] sm:$0xff] %v94_v40  ;;  %v227_v42 = vmul.f32 %v170_v2, %v94_v40 }
  0xb3   :  { %v470_v43 = vpack.c.bf16 %v223_v41, %v222_v26  ;;  %v383_v44 = vmul.f32 %v310_v12, %v223_v41 }
  0xb4   :  { %v105_v45 = vpop.f32.mrf.mxu2  ;;  %v480_v49 = vpack.c.bf16 %v227_v42, %v226_v27 }
  0xb5   :  { %471 = vst [vmem:[#allocation4] sm:$0xff] %v470_v43   ;;  %v106_v46 = vadd.f32 %v913_v18, %v105_v45  ;;  %v117_v47 = vpop.f32.mrf.mxu3  ;;  %v335_v48 = vpop.permute.xlu1 %334 }
  0xb6   :  { %399 = vst [vmem:[#allocation6 + $0x8] sm:$0xff] %v383_v44  ;;  %v118_v50 = vadd.f32 %v913_v18, %v117_v47  ;;  %v330_v51 = vpop.permute.xlu0 %329  ;;  %v84_v52 = vpop.f32.mrf.mxu0 }
  0xb7   :  { %247 = vst [vmem:[#allocation2 + $0x48] sm:$0xff] %v106_v46  ;;  %v387_v53 = vmul.f32 %v330_v51, %v227_v42  ;;  %v85_v54 = vadd.f32 %v913_v18, %v84_v52  ;;  %v96_v55 = vpop.f32.mrf.mxu1  ;;  %v231_v1 = vmul.f32 %v906_v14, %v106_v46 }
  0xb8   :  { %v933_v56 = vmul.f32 %v210_v16, %v118_v50  ;;  %251 = vst [vmem:[#allocation2 + $0x68] sm:$0xff] %v118_v50  ;;  %v97_v57 = vadd.f32 %v913_v18, %v96_v55 }
  0xb9   :  { %508 = vst [vmem:[#allocation4 + $0x10] sm:$0xff] %v480_v49   ;;  %v224_v59 = vmul.f32 %v892_v4, %v85_v54  ;;  %v490_v14 = vpack.c.bf16 %v231_v1, %v230_v15 }
  0xba   :  { %v395_v60 = vmul.f32 %v370_v58, %v933_v56  ;;  %403 = vst [vmem:[#allocation6 + $0x28] sm:$0xff] %v387_v53  ;;  %v228_v61 = vmul.f32 %v902_v11, %v97_v57 }
  0xbb   :  { %240 = vst [vmem:[#allocation2 + $0x10] sm:$0xff] %v85_v54  ;;  %v384_v62 = vmul.f32 %v315_v35, %v224_v59 }
  0xbc   :  { %411 = vst [vmem:[#allocation6 + $0x68] sm:$0xff] %v395_v60  ;;  %v388_v63 = vmul.f32 %v335_v48, %v228_v61  ;;  %v108_v0 = vpop.f32.mrf.mxu2 }
  0xbd   :  { %400 = vst [vmem:[#allocation6 + $0x10] sm:$0xff] %v384_v62  ;;  %v109_v2 = vadd.f32 %v913_v18, %v108_v0  ;;  %v120_v5 = vpop.f32.mrf.mxu3  ;;  %v350_v8 = vpop.permute.xlu1 %349 }
  0xbe   :  { %244 = vst [vmem:[#allocation2 + $0x30] sm:$0xff] %v97_v57  ;;  %v391_v12 = vmul.f32 %v350_v8, %v231_v1  ;;  %v345_v4 = vpop.permute.xlu0 %344  ;;  %v87_v16 = vpop.f32.mrf.mxu0  ;;  %v121_v20 = vadd.f32 %v913_v18, %v120_v5 }
  0xbf   :  { %404 = vst [vmem:[#allocation6 + $0x30] sm:$0xff] %v388_v63  ;;  %v232_v11 = vmul.f32 %v904_v13, %v109_v2  ;;  %v88_v22 = vadd.f32 %v913_v18, %v87_v16  ;;  %v99_v23 = vpop.f32.mrf.mxu1  ;;  %v390_v26 = vmul.f32 %v345_v4, %v230_v15 }
  0xc0   :  { %248 = vst [vmem:[#allocation2 + $0x50] sm:$0xff] %v109_v2  ;;  %v100_v24 = vadd.f32 %v913_v18, %v99_v23  ;;  %v236_v42 = vmul.f32 %v898_v9, %v121_v20 }
  0xc1   :  { %v392_v25 = vmul.f32 %v355_v37, %v232_v11  ;;  %252 = vst [vmem:[#allocation2 + $0x70] sm:$0xff] %v121_v20  ;;  %v225_v27 = vmul.f32 %v896_v7, %v88_v22 }
  0xc2   :  { %407 = vst [vmem:[#allocation6 + $0x48] sm:$0xff] %v391_v12  ;;  %v229_v3 = vmul.f32 %v900_v10, %v100_v24  ;;  %v234_v10 = vmul.f32 %v908_v17, %v925_v34 }
  0xc3   :  { %408 = vst [vmem:[#allocation6 + $0x50] sm:$0xff] %v392_v25  ;;  %v475_v28 = vpack.c.bf16 %v225_v27, %v224_v59  ;;  %v385_v13 = vmul.f32 %v922_v33, %v225_v27 }
  0xc4   :  { %510 = vst [vmem:[#allocation4 + $0x20] sm:$0xff] %v490_v14   ;;  %v111_v29 = vpop.f32.mrf.mxu2  ;;  %v485_v35 = vpack.c.bf16 %v229_v3, %v228_v61  ;;  %v389_v7 = vmul.f32 %v915_v19, %v229_v3  ;;  %v500_v19 = vpack.c.bf16 %v933_v56, %v234_v10 }
  0xc5   :  { %406 = vst [vmem:[#allocation6 + $0x40] sm:$0xff] %v390_v26  ;;  %v112_v30 = vadd.f32 %v913_v18, %v111_v29  ;;  %v123_v31 = vpop.f32.mrf.mxu3  ;;  %v365_v32 = vpop.permute.xlu1 %364 }
  0xc6   :  { %241 = vst [vmem:[#allocation2 + $0x18] sm:$0xff] %v88_v22  ;;  %v360_v36 = vpop.permute.xlu0 %359  ;;  %v124_v37 = vadd.f32 %v913_v18, %v123_v31  ;;  %v394_v18 = vmul.f32 %v365_v32, %v234_v10 }
  0xc7   :  { %507 = vst [vmem:[#allocation4 + $0x8] sm:$0xff] %v475_v28   ;;  %v233_v33 = vmul.f32 %v894_v6, %v112_v30 }
  0xc8   :  { %401 = vst [vmem:[#allocation6 + $0x18] sm:$0xff] %v385_v13  ;;  %v237_v38 = vmul.f32 %v917_v21, %v124_v37 }
  0xc9   :  { %245 = vst [vmem:[#allocation2 + $0x38] sm:$0xff] %v100_v24  ;;  %v495_v39 = vpack.c.bf16 %v233_v33, %v232_v11  ;;  %v393_v40 = vmul.f32 %v360_v36, %v233_v33 }
  0xca   :  { %509 = vst [vmem:[#allocation4 + $0x18] sm:$0xff] %v485_v35   ;;  %v505_v21 = vpack.c.bf16 %v237_v38, %v236_v42 }
  0xcb   :  { %405 = vst [vmem:[#allocation6 + $0x38] sm:$0xff] %v389_v7 }
  0xcc   :  { %249 = vst [vmem:[#allocation2 + $0x58] sm:$0xff] %v112_v30 }
  0xcd   :  { %253 = vst [vmem:[#allocation2 + $0x78] sm:$0xff] %v124_v37  ;;  %v380_v41 = vpop.permute.xlu1 %379 }
  0xce   :  { %512 = vst [vmem:[#allocation4 + $0x30] sm:$0xff] %v500_v19   ;;  %v397_v6 = vmul.f32 %v380_v41, %v237_v38  ;;  %v375_v17 = vpop.permute.xlu0 %374  ;;  %426 = dma.vmem_to_hbm [thread:$0]  %s419_s9, 2048, %s421_s12, [#allocation3], %s653_s3, %s653_s3, %s654_s0  }
  0xcf   :  { %410 = vst [vmem:[#allocation6 + $0x60] sm:$0xff] %v394_v18  ;;  %v396_v9 = vmul.f32 %v375_v17, %v236_v42 }
  0xd0   :  { %511 = vst [vmem:[#allocation4 + $0x28] sm:$0xff] %v495_v39  }
  0xd1   :  { %409 = vst [vmem:[#allocation6 + $0x58] sm:$0xff] %v393_v40 }
  0xd2   :  { %413 = vst [vmem:[#allocation6 + $0x78] sm:$0xff] %v397_v6 }
  0xd3   :  { %513 = vst [vmem:[#allocation4 + $0x38] sm:$0xff] %v505_v21  }
  0xd4   :  { %412 = vst [vmem:[#allocation6 + $0x70] sm:$0xff] %v396_v9  ;;  %439 = dma.vmem_to_hbm [thread:$0]  %s432_s13, 1024, %s434_s16, [#allocation5], %s656_s6, %s656_s6, %s657_s21  }
  0xd5   :  { %452 = dma.vmem_to_hbm [thread:$0]  %s445_s18, 2048, %s447_s1, [#allocation5], %s653_s3, %s653_s3, %s654_s0  }
  0xd6   :  { %646 = dma.done.wait [#allocation3], 2048  }
  0xd7   :  { %647 = vsyncadd [#allocation3], 4294965248 }
  0xd8   :  { %648 = dma.done.wait [#allocation5], 3072  }
  0xd9   :  { %649 = vsyncadd [#allocation5], 4294964224 }
  0xda   :  { %465 = vsyncpa [#allocation3], 1 }
  0xdb   :  { %466 = vsyncpa [#allocation5], 1 }

</bundles_post_ra>
